<compile_context>
chip_gen: v6e
topology: v6e:2x2x1
jax: 0.10.0
libtpu: 0.0.40
codegen_flags: <defaults>
</compile_context>

<pallas_src>
import numpy as np
import jax
import jax.numpy as jnp
from jax import lax
from jax.experimental import pallas as pl
from jax.experimental.pallas import tpu as pltpu

EPS = 1e-5


# --------------------------------------------------------------------------
# Kernel
# --------------------------------------------------------------------------
def downblock_kernel(
    x_ref,                               # (N*H, W*Cin)    f32  lane-dense input
    su_ref, sd_ref,                      # (N*H, N*H)      row shift-up / shift-down
    B1_ref, g1_ref, be1_ref,             # (3, W*Cin, W*Cout), (1, W*Cout) x2
    B2_ref, g2_ref, be2_ref,             # (3, W*Cout, W*Cout), (1, W*Cout) x2
    R_ref, br_ref,                       # (W*Cin, W*Cout), (1, W*Cout)  residual 1x1
    P_ref,                               # (W*Cout, W*Cout) channel-avg matrix (1/NHW folded in)
    o_ref,                               # (N*H, W*Cout)   f32  lane-dense output
):
    f32 = jnp.float32
    x = x_ref[...]
    su = su_ref[...]
    sd = sd_ref[...]
    P = P_ref[...]

    def conv3x3(z, B_ref):
        # y[n,h] = z[n,h-1] @ B0 + z[n,h] @ B1 + z[n,h+1] @ B2
        # The kw taps and W-direction zero padding live inside the banded B's;
        # the H-direction shift + per-image zero border lives inside su / sd.
        # Conv bias is intentionally omitted: it is absorbed by the following
        # BatchNorm (mean-subtraction cancels it, variance is unaffected).
        z_up = jnp.dot(su, z, preferred_element_type=f32)
        z_dn = jnp.dot(sd, z, preferred_element_type=f32)
        y = jnp.dot(z_up, B_ref[0], preferred_element_type=f32)
        y = y + jnp.dot(z, B_ref[1], preferred_element_type=f32)
        y = y + jnp.dot(z_dn, B_ref[2], preferred_element_type=f32)
        return y

    def batchnorm(y, gamma, beta):
        # One-pass stats: sublane-reduce sum and sum-of-squares, then one tiny
        # matmul with P maps per-lane sums -> per-channel means broadcast back
        # over the fused W*C lane axis.  Biased variance (training-mode BN).
        s1 = jnp.sum(y, axis=0, keepdims=True)          # (1, WC)
        s2 = jnp.sum(y * y, axis=0, keepdims=True)      # (1, WC)
        mean = jnp.dot(s1, P, preferred_element_type=f32)
        ex2 = jnp.dot(s2, P, preferred_element_type=f32)
        var = ex2 - mean * mean
        return (y - mean) * (lax.rsqrt(var + EPS) * gamma) + beta

    # ---- residual 1x1 conv first (lowest live-temporary footprint) ----
    res = jnp.dot(x, R_ref[...], preferred_element_type=f32) + br_ref[...]

    # ---- conv1 -> bn1 -> relu ----
    y = conv3x3(x, B1_ref)
    y = jnp.maximum(batchnorm(y, g1_ref[...], be1_ref[...]), 0.0)

    # ---- conv2 -> bn2 ----
    y = conv3x3(y, B2_ref)
    y = batchnorm(y, g2_ref[...], be2_ref[...])

    # ---- add + relu : full 128-lane dense store ----
    o_ref[...] = jnp.maximum(y + res, 0.0)


# --------------------------------------------------------------------------
# Host-side constant packing (all static-shape, jit-compatible)
# --------------------------------------------------------------------------
def _band_conv3x3(w, W):
    """(3,3,Cin,Cout) -> (3, W*Cin, W*Cout) banded weights for the fused-W matmul.

    B[kh, wi*Cin+ci, wo*Cout+co] = w[kh, wi-wo+1, ci, co] if |wi-wo|<=1 else 0.
    Out-of-range wi implements the W-direction zero padding for free.
    """
    KH, KW, Cin, Cout = w.shape
    wi = np.arange(W)[None, :, None]
    wo = np.arange(W)[None, None, :]
    kw = np.arange(KW)[:, None, None]
    T = jnp.asarray((wi == wo + kw - 1).astype(np.float32))      # (KW, W, W)
    B = jnp.einsum("kio,hkcd->hicod", T, w)                      # (KH, W, Cin, W, Cout)
    return B.reshape(KH, W * Cin, W * Cout)


def _band_conv1x1(wr, W):
    """(Cin,Cout) -> (W*Cin, W*Cout) block-diagonal weights (1x1 conv)."""
    Cin, Cout = wr.shape
    eye = jnp.asarray(np.eye(W, dtype=np.float32))
    return jnp.einsum("io,cd->icod", eye, wr).reshape(W * Cin, W * Cout)


def _row_shift_mats(N, H):
    """(N*H, N*H) shift-up / shift-down matrices with per-image zero borders."""
    NH = N * H
    r = np.arange(NH)
    up = np.zeros((NH, NH), np.float32)
    dn = np.zeros((NH, NH), np.float32)
    ok_up = (r % H) != 0
    up[r[ok_up], r[ok_up] - 1] = 1.0          # x_up[r] = x[r-1]  (0 at h==0)
    ok_dn = (r % H) != H - 1
    dn[r[ok_dn], r[ok_dn] + 1] = 1.0          # x_dn[r] = x[r+1]  (0 at h==H-1)
    return jnp.asarray(up), jnp.asarray(dn)


def _channel_avg(W, Cout, denom):
    """(W*Cout, W*Cout) matrix: per-lane sums -> per-channel means broadcast
    back over the fused W*Cout lane axis (includes the 1/(N*H*W) factor)."""
    P = (np.ones((W, W), np.float32)[:, None, :, None]
         * np.eye(Cout, dtype=np.float32)[None, :, None, :]) / float(denom)
    return jnp.asarray(P.reshape(W * Cout, W * Cout))


def _lane_vec(v, W):
    """(C,) per-channel vector -> (1, W*C) lane-dense (channel fastest)."""
    return jnp.tile(v.reshape(1, -1), (1, W))


# --------------------------------------------------------------------------
# Wrapper
# --------------------------------------------------------------------------
@jax.jit
def downblock_pallas(x_nhwc, params):
    N, H, W, Cin = x_nhwc.shape
    Cout = params["w1"].shape[-1]
    NH, WCin, WCout = N * H, W * Cin, W * Cout

    su, sd = _row_shift_mats(N, H)

    args = (
        x_nhwc.reshape(NH, WCin).astype(jnp.float32),   # free metadata reshape
        su, sd,
        _band_conv3x3(params["w1"], W),
        _lane_vec(params["g1"], W), _lane_vec(params["be1"], W),
        _band_conv3x3(params["w2"], W),
        _lane_vec(params["g2"], W), _lane_vec(params["be2"], W),
        _band_conv1x1(params["wr"], W), _lane_vec(params["br"], W),
        _channel_avg(W, Cout, N * H * W),
    )

    vmem = pl.BlockSpec(memory_space=pltpu.MemorySpace.VMEM)
    out2d = pl.pallas_call(
        downblock_kernel,
        out_shape=jax.ShapeDtypeStruct((NH, WCout), jnp.float32),
        in_specs=[vmem] * len(args),
        out_specs=vmem,
    )(*args)

    return out2d.reshape(N, H, W, Cout)


# --------------------------------------------------------------------------
# Pure-JAX reference (lax conv) mirroring the PyTorch forward
# --------------------------------------------------------------------------
def downblock_reference(x_nhwc, params):
    def conv(x, w, b):
        y = lax.conv_general_dilated(
            x, w, window_strides=(1, 1), padding="SAME",
            dimension_numbers=("NHWC", "HWIO", "NHWC"))
        return y + b

    def bn(y, g, be):
        m = jnp.mean(y, axis=(0, 1, 2), keepdims=True)
        v = jnp.mean((y - m) ** 2, axis=(0, 1, 2), keepdims=True)
        return (y - m) / jnp.sqrt(v + EPS) * g + be

    y = conv(x_nhwc, params["w1"], params["b1"])
    y = jnp.maximum(bn(y, params["g1"], params["be1"]), 0.0)
    y = conv(y, params["w2"], params["b2"])
    y = bn(y, params["g2"], params["be2"])
    res = jnp.einsum("nhwi,io->nhwo", x_nhwc, params["wr"]) + params["br"]
    return jnp.maximum(y + res, 0.0)


def make_params(key, cin, cout):
    ks = jax.random.split(key, 10)
    return {
        "w1": 0.1 * jax.random.normal(ks[0], (3, 3, cin, cout), jnp.float32),
        "b1": 0.1 * jax.random.normal(ks[1], (cout,), jnp.float32),
        "g1": 1.0 + 0.1 * jax.random.normal(ks[2], (cout,), jnp.float32),
        "be1": 0.1 * jax.random.normal(ks[3], (cout,), jnp.float32),
        "w2": 0.1 * jax.random.normal(ks[4], (3, 3, cout, cout), jnp.float32),
        "b2": 0.1 * jax.random.normal(ks[5], (cout,), jnp.float32),
        "g2": 1.0 + 0.1 * jax.random.normal(ks[6], (cout,), jnp.float32),
        "be2": 0.1 * jax.random.normal(ks[7], (cout,), jnp.float32),
        "wr": 0.1 * jax.random.normal(ks[8], (cin, cout), jnp.float32),   # 1x1 conv
        "br": 0.1 * jax.random.normal(ks[9], (cout,), jnp.float32),
    }


if __name__ == "__main__":
    key = jax.random.PRNGKey(0)
    kx, kp = jax.random.split(key)

    N, Cin, H, W = 2, 4, 16, 16      # NCHW like the PyTorch module
    Cout = 8
    x_nchw = jax.random.normal(kx, (N, Cin, H, W), jnp.float32)
    params = make_params(kp, Cin, Cout)

    # layout: PyTorch-style NCHW -> NHWC for the TPU kernel.
    x_nhwc = jnp.transpose(x_nchw, (0, 2, 3, 1))

    out_nhwc = downblock_pallas(x_nhwc, params)
    out_nhwc = jax.block_until_ready(out_nhwc)
    out_nchw = jnp.transpose(out_nhwc, (0, 3, 1, 2))   # back to PyTorch layout

    ref_nhwc = downblock_reference(x_nhwc, params)
    assert out_nchw.shape == (N, Cout, H, W)
    max_err = float(jnp.max(jnp.abs(out_nhwc - ref_nhwc)))
    assert jnp.allclose(out_nhwc, ref_nhwc, atol=1e-4, rtol=1e-4), max_err

    print("KERNEL_OK")
</pallas_src>

<mosaic_0001>
module attributes {stable_mosaic.version = 11 : i64} {
  func.func @downblock_kernel(%arg0: memref<32x64xf32, #tpu.memory_space<vmem>>, %arg1: memref<32x32xf32, #tpu.memory_space<vmem>>, %arg2: memref<32x32xf32, #tpu.memory_space<vmem>>, %arg3: memref<3x64x128xf32, #tpu.memory_space<vmem>>, %arg4: memref<1x128xf32, #tpu.memory_space<vmem>>, %arg5: memref<1x128xf32, #tpu.memory_space<vmem>>, %arg6: memref<3x128x128xf32, #tpu.memory_space<vmem>>, %arg7: memref<1x128xf32, #tpu.memory_space<vmem>>, %arg8: memref<1x128xf32, #tpu.memory_space<vmem>>, %arg9: memref<64x128xf32, #tpu.memory_space<vmem>>, %arg10: memref<1x128xf32, #tpu.memory_space<vmem>>, %arg11: memref<128x128xf32, #tpu.memory_space<vmem>>, %arg12: memref<32x128xf32, #tpu.memory_space<vmem>>) attributes {dimension_semantics = [], scalar_prefetch = 0 : i64, scratch_operands = 0 : i64, tpu.core_type = #tpu.core_type<tc>} {
    %c0 = arith.constant 0 : index
    %c0_0 = arith.constant 0 : index
    %0 = vector.load %arg0[%c0, %c0_0] : memref<32x64xf32, #tpu.memory_space<vmem>>, vector<32x64xf32>
    %c0_1 = arith.constant 0 : index
    %c0_2 = arith.constant 0 : index
    %1 = vector.load %arg1[%c0_1, %c0_2] : memref<32x32xf32, #tpu.memory_space<vmem>>, vector<32x32xf32>
    %c0_3 = arith.constant 0 : index
    %c0_4 = arith.constant 0 : index
    %2 = vector.load %arg2[%c0_3, %c0_4] : memref<32x32xf32, #tpu.memory_space<vmem>>, vector<32x32xf32>
    %c0_5 = arith.constant 0 : index
    %c0_6 = arith.constant 0 : index
    %3 = vector.load %arg11[%c0_5, %c0_6] : memref<128x128xf32, #tpu.memory_space<vmem>>, vector<128x128xf32>
    %c0_7 = arith.constant 0 : index
    %c0_8 = arith.constant 0 : index
    %4 = vector.load %arg9[%c0_7, %c0_8] : memref<64x128xf32, #tpu.memory_space<vmem>>, vector<64x128xf32>
    %cst = arith.constant dense<0.000000e+00> : vector<32x128xf32>
    %5 = tpu.matmul %0, %4, %cst {dimension_numbers = #tpu.dot_dimension_numbers<[1], [0], [0], [1], [0, 0, 1, 1], [], []>} : vector<32x64xf32>, vector<64x128xf32>, vector<32x128xf32> -> vector<32x128xf32>
    %c0_9 = arith.constant 0 : index
    %c0_10 = arith.constant 0 : index
    %6 = vector.load %arg10[%c0_9, %c0_10] : memref<1x128xf32, #tpu.memory_space<vmem>>, vector<1x128xf32>
    %7 = vector.broadcast %6 : vector<1x128xf32> to vector<32x128xf32>
    %8 = arith.addf %5, %7 : vector<32x128xf32>
    %cst_11 = arith.constant dense<0.000000e+00> : vector<32x64xf32>
    %9 = tpu.matmul %1, %0, %cst_11 {dimension_numbers = #tpu.dot_dimension_numbers<[1], [0], [0], [1], [0, 0, 1, 1], [], []>} : vector<32x32xf32>, vector<32x64xf32>, vector<32x64xf32> -> vector<32x64xf32>
    %cst_12 = arith.constant dense<0.000000e+00> : vector<32x64xf32>
    %10 = tpu.matmul %2, %0, %cst_12 {dimension_numbers = #tpu.dot_dimension_numbers<[1], [0], [0], [1], [0, 0, 1, 1], [], []>} : vector<32x32xf32>, vector<32x64xf32>, vector<32x64xf32> -> vector<32x64xf32>
    %c0_13 = arith.constant 0 : index
    %c0_14 = arith.constant 0 : index
    %c0_15 = arith.constant 0 : index
    %11 = vector.load %arg3[%c0_13, %c0_14, %c0_15] : memref<3x64x128xf32, #tpu.memory_space<vmem>>, vector<1x64x128xf32>
    %12 = vector.shape_cast %11 : vector<1x64x128xf32> to vector<64x128xf32>
    %cst_16 = arith.constant dense<0.000000e+00> : vector<32x128xf32>
    %13 = tpu.matmul %9, %12, %cst_16 {dimension_numbers = #tpu.dot_dimension_numbers<[1], [0], [0], [1], [0, 0, 1, 1], [], []>} : vector<32x64xf32>, vector<64x128xf32>, vector<32x128xf32> -> vector<32x128xf32>
    %c1 = arith.constant 1 : index
    %c0_17 = arith.constant 0 : index
    %c0_18 = arith.constant 0 : index
    %14 = vector.load %arg3[%c1, %c0_17, %c0_18] : memref<3x64x128xf32, #tpu.memory_space<vmem>>, vector<1x64x128xf32>
    %15 = vector.shape_cast %14 : vector<1x64x128xf32> to vector<64x128xf32>
    %cst_19 = arith.constant dense<0.000000e+00> : vector<32x128xf32>
    %16 = tpu.matmul %0, %15, %cst_19 {dimension_numbers = #tpu.dot_dimension_numbers<[1], [0], [0], [1], [0, 0, 1, 1], [], []>} : vector<32x64xf32>, vector<64x128xf32>, vector<32x128xf32> -> vector<32x128xf32>
    %17 = arith.addf %13, %16 : vector<32x128xf32>
    %c2 = arith.constant 2 : index
    %c0_20 = arith.constant 0 : index
    %c0_21 = arith.constant 0 : index
    %18 = vector.load %arg3[%c2, %c0_20, %c0_21] : memref<3x64x128xf32, #tpu.memory_space<vmem>>, vector<1x64x128xf32>
    %19 = vector.shape_cast %18 : vector<1x64x128xf32> to vector<64x128xf32>
    %cst_22 = arith.constant dense<0.000000e+00> : vector<32x128xf32>
    %20 = tpu.matmul %10, %19, %cst_22 {dimension_numbers = #tpu.dot_dimension_numbers<[1], [0], [0], [1], [0, 0, 1, 1], [], []>} : vector<32x64xf32>, vector<64x128xf32>, vector<32x128xf32> -> vector<32x128xf32>
    %21 = arith.addf %17, %20 : vector<32x128xf32>
    %c0_23 = arith.constant 0 : index
    %c0_24 = arith.constant 0 : index
    %22 = vector.load %arg4[%c0_23, %c0_24] : memref<1x128xf32, #tpu.memory_space<vmem>>, vector<1x128xf32>
    %c0_25 = arith.constant 0 : index
    %c0_26 = arith.constant 0 : index
    %23 = vector.load %arg5[%c0_25, %c0_26] : memref<1x128xf32, #tpu.memory_space<vmem>>, vector<1x128xf32>
    %cst_27 = arith.constant dense<0.000000e+00> : vector<128xf32>
    %24 = vector.multi_reduction <add>, %21, %cst_27 [0] : vector<32x128xf32> to vector<128xf32>
    %25 = vector.shape_cast %24 : vector<128xf32> to vector<1x128xf32>
    %26 = arith.mulf %21, %21 : vector<32x128xf32>
    %cst_28 = arith.constant dense<0.000000e+00> : vector<128xf32>
    %27 = vector.multi_reduction <add>, %26, %cst_28 [0] : vector<32x128xf32> to vector<128xf32>
    %28 = vector.shape_cast %27 : vector<128xf32> to vector<1x128xf32>
    %cst_29 = arith.constant dense<0.000000e+00> : vector<1x128xf32>
    %29 = tpu.matmul %25, %3, %cst_29 {dimension_numbers = #tpu.dot_dimension_numbers<[1], [0], [0], [1], [0, 0, 1, 1], [], []>} : vector<1x128xf32>, vector<128x128xf32>, vector<1x128xf32> -> vector<1x128xf32>
    %cst_30 = arith.constant dense<0.000000e+00> : vector<1x128xf32>
    %30 = tpu.matmul %28, %3, %cst_30 {dimension_numbers = #tpu.dot_dimension_numbers<[1], [0], [0], [1], [0, 0, 1, 1], [], []>} : vector<1x128xf32>, vector<128x128xf32>, vector<1x128xf32> -> vector<1x128xf32>
    %31 = arith.mulf %29, %29 : vector<1x128xf32>
    %32 = arith.subf %30, %31 : vector<1x128xf32>
    %33 = vector.broadcast %29 : vector<1x128xf32> to vector<32x128xf32>
    %34 = arith.subf %21, %33 : vector<32x128xf32>
    %cst_31 = arith.constant 9.99999974E-6 : f32
    %35 = vector.broadcast %cst_31 : f32 to vector<1x128xf32>
    %36 = arith.addf %32, %35 : vector<1x128xf32>
    %37 = math.rsqrt %36 : vector<1x128xf32>
    %38 = arith.mulf %37, %22 : vector<1x128xf32>
    %39 = vector.broadcast %38 : vector<1x128xf32> to vector<32x128xf32>
    %40 = arith.mulf %34, %39 : vector<32x128xf32>
    %41 = vector.broadcast %23 : vector<1x128xf32> to vector<32x128xf32>
    %42 = arith.addf %40, %41 : vector<32x128xf32>
    %cst_32 = arith.constant 0.000000e+00 : f32
    %43 = vector.broadcast %cst_32 : f32 to vector<32x128xf32>
    %44 = arith.maximumf %42, %43 : vector<32x128xf32>
    %cst_33 = arith.constant dense<0.000000e+00> : vector<32x128xf32>
    %45 = tpu.matmul %1, %44, %cst_33 {dimension_numbers = #tpu.dot_dimension_numbers<[1], [0], [0], [1], [0, 0, 1, 1], [], []>} : vector<32x32xf32>, vector<32x128xf32>, vector<32x128xf32> -> vector<32x128xf32>
    %cst_34 = arith.constant dense<0.000000e+00> : vector<32x128xf32>
    %46 = tpu.matmul %2, %44, %cst_34 {dimension_numbers = #tpu.dot_dimension_numbers<[1], [0], [0], [1], [0, 0, 1, 1], [], []>} : vector<32x32xf32>, vector<32x128xf32>, vector<32x128xf32> -> vector<32x128xf32>
    %c0_35 = arith.constant 0 : index
    %c0_36 = arith.constant 0 : index
    %c0_37 = arith.constant 0 : index
    %47 = vector.load %arg6[%c0_35, %c0_36, %c0_37] : memref<3x128x128xf32, #tpu.memory_space<vmem>>, vector<1x128x128xf32>
    %48 = vector.shape_cast %47 : vector<1x128x128xf32> to vector<128x128xf32>
    %cst_38 = arith.constant dense<0.000000e+00> : vector<32x128xf32>
    %49 = tpu.matmul %45, %48, %cst_38 {dimension_numbers = #tpu.dot_dimension_numbers<[1], [0], [0], [1], [0, 0, 1, 1], [], []>} : vector<32x128xf32>, vector<128x128xf32>, vector<32x128xf32> -> vector<32x128xf32>
    %c1_39 = arith.constant 1 : index
    %c0_40 = arith.constant 0 : index
    %c0_41 = arith.constant 0 : index
    %50 = vector.load %arg6[%c1_39, %c0_40, %c0_41] : memref<3x128x128xf32, #tpu.memory_space<vmem>>, vector<1x128x128xf32>
    %51 = vector.shape_cast %50 : vector<1x128x128xf32> to vector<128x128xf32>
    %cst_42 = arith.constant dense<0.000000e+00> : vector<32x128xf32>
    %52 = tpu.matmul %44, %51, %cst_42 {dimension_numbers = #tpu.dot_dimension_numbers<[1], [0], [0], [1], [0, 0, 1, 1], [], []>} : vector<32x128xf32>, vector<128x128xf32>, vector<32x128xf32> -> vector<32x128xf32>
    %53 = arith.addf %49, %52 : vector<32x128xf32>
    %c2_43 = arith.constant 2 : index
    %c0_44 = arith.constant 0 : index
    %c0_45 = arith.constant 0 : index
    %54 = vector.load %arg6[%c2_43, %c0_44, %c0_45] : memref<3x128x128xf32, #tpu.memory_space<vmem>>, vector<1x128x128xf32>
    %55 = vector.shape_cast %54 : vector<1x128x128xf32> to vector<128x128xf32>
    %cst_46 = arith.constant dense<0.000000e+00> : vector<32x128xf32>
    %56 = tpu.matmul %46, %55, %cst_46 {dimension_numbers = #tpu.dot_dimension_numbers<[1], [0], [0], [1], [0, 0, 1, 1], [], []>} : vector<32x128xf32>, vector<128x128xf32>, vector<32x128xf32> -> vector<32x128xf32>
    %57 = arith.addf %53, %56 : vector<32x128xf32>
    %c0_47 = arith.constant 0 : index
    %c0_48 = arith.constant 0 : index
    %58 = vector.load %arg7[%c0_47, %c0_48] : memref<1x128xf32, #tpu.memory_space<vmem>>, vector<1x128xf32>
    %c0_49 = arith.constant 0 : index
    %c0_50 = arith.constant 0 : index
    %59 = vector.load %arg8[%c0_49, %c0_50] : memref<1x128xf32, #tpu.memory_space<vmem>>, vector<1x128xf32>
    %cst_51 = arith.constant dense<0.000000e+00> : vector<128xf32>
    %60 = vector.multi_reduction <add>, %57, %cst_51 [0] : vector<32x128xf32> to vector<128xf32>
    %61 = vector.shape_cast %60 : vector<128xf32> to vector<1x128xf32>
    %62 = arith.mulf %57, %57 : vector<32x128xf32>
    %cst_52 = arith.constant dense<0.000000e+00> : vector<128xf32>
    %63 = vector.multi_reduction <add>, %62, %cst_52 [0] : vector<32x128xf32> to vector<128xf32>
    %64 = vector.shape_cast %63 : vector<128xf32> to vector<1x128xf32>
    %cst_53 = arith.constant dense<0.000000e+00> : vector<1x128xf32>
    %65 = tpu.matmul %61, %3, %cst_53 {dimension_numbers = #tpu.dot_dimension_numbers<[1], [0], [0], [1], [0, 0, 1, 1], [], []>} : vector<1x128xf32>, vector<128x128xf32>, vector<1x128xf32> -> vector<1x128xf32>
    %cst_54 = arith.constant dense<0.000000e+00> : vector<1x128xf32>
    %66 = tpu.matmul %64, %3, %cst_54 {dimension_numbers = #tpu.dot_dimension_numbers<[1], [0], [0], [1], [0, 0, 1, 1], [], []>} : vector<1x128xf32>, vector<128x128xf32>, vector<1x128xf32> -> vector<1x128xf32>
    %67 = arith.mulf %65, %65 : vector<1x128xf32>
    %68 = arith.subf %66, %67 : vector<1x128xf32>
    %69 = vector.broadcast %65 : vector<1x128xf32> to vector<32x128xf32>
    %70 = arith.subf %57, %69 : vector<32x128xf32>
    %cst_55 = arith.constant 9.99999974E-6 : f32
    %71 = vector.broadcast %cst_55 : f32 to vector<1x128xf32>
    %72 = arith.addf %68, %71 : vector<1x128xf32>
    %73 = math.rsqrt %72 : vector<1x128xf32>
    %74 = arith.mulf %73, %58 : vector<1x128xf32>
    %75 = vector.broadcast %74 : vector<1x128xf32> to vector<32x128xf32>
    %76 = arith.mulf %70, %75 : vector<32x128xf32>
    %77 = vector.broadcast %59 : vector<1x128xf32> to vector<32x128xf32>
    %78 = arith.addf %76, %77 : vector<32x128xf32>
    %79 = arith.addf %78, %8 : vector<32x128xf32>
    %cst_56 = arith.constant 0.000000e+00 : f32
    %80 = vector.broadcast %cst_56 : f32 to vector<32x128xf32>
    %81 = arith.maximumf %79, %80 : vector<32x128xf32>
    %c0_57 = arith.constant 0 : index
    %c0_58 = arith.constant 0 : index
    %82 = vector.load %arg12[%c0_57, %c0_58] : memref<32x128xf32, #tpu.memory_space<vmem>>, vector<32x128xf32>
    tpu.vector_store %arg12[%c0_57, %c0_58], %81 {strides = array<i32>} : memref<32x128xf32, #tpu.memory_space<vmem>>, vector<32x128xf32>,
    return
  }
}

</mosaic_0001>

<bundles_post_ra>
// kernel: downblock_pallas.1
= control target key start
LH: loop header
LB: loop body
LE: loop exit
PB: predicated region body
PF: predicated region fallthrough
CT: control target
= control target key end

     0   :  { %vm84_vm0 = vcmask 523264   ;;  %vm182_vm1 = vcmask 261120   ;;  %v2270_v56 = vmov 0.0   ;;  %vm2271_vm2 = vmmov 0   ;;  %s2994_s9 = inlined_call_operand.vmem [shape: f32[64,128], index: 9, kind: input, shape index: {}]   ;;  %s2995_s0 = inlined_call_operand.vmem [shape: f32[32,64], index: 0, kind: input, shape index: {}]   ;;  %s2996_s3 = inlined_call_operand.vmem [shape: f32[3,64,128], index: 3, kind: input, shape index: {}]   ;;  %s2997_s1 = inlined_call_operand.vmem [shape: f32[32,32], index: 1, kind: input, shape index: {}]   ;;  %s2998_s2 = inlined_call_operand.vmem [shape: f32[32,32], index: 2, kind: input, shape index: {}]   ;;  %s2999_s11 = inlined_call_operand.vmem [shape: f32[128,128], index: 11, kind: input, shape index: {}]   ;;  %s3000_s6 = inlined_call_operand.vmem [shape: f32[3,128,128], index: 6, kind: input, shape index: {}]   ;;  %s3001_s4 = inlined_call_operand.vmem [shape: f32[1,128], index: 4, kind: input, shape index: {}]   ;;  %s3002_s5 = inlined_call_operand.vmem [shape: f32[1,128], index: 5, kind: input, shape index: {}]   ;;  %s3003_s7 = inlined_call_operand.vmem [shape: f32[1,128], index: 7, kind: input, shape index: {}]   ;;  %s3004_s10 = inlined_call_operand.vmem [shape: f32[1,128], index: 10, kind: input, shape index: {}]   ;;  %s3005_s8 = inlined_call_operand.vmem [shape: f32[1,128], index: 8, kind: input, shape index: {}]   ;;  %s3006_s12 = inlined_call_operand.vmem [shape: f32[32,128], index: 12, kind: output, shape index: {}]  }
   0x1   :  { %v76_v0 = vld [vmem:[%s2994_s9 + $0x38] sm:$0xff]  ;;  %v75_v1 = vld [vmem:[%s2994_s9 + $0x30] sm:$0xff]  ;;  %v74_v2 = vld [vmem:[%s2994_s9 + $0x28] sm:$0xff] }
   0x2   :  { %1866 = vmatprep.subr.mxu1 %v76_v0  ;;  %v2349_v3 = vld [vmem:[%s2995_s0] sm:$0xff]  ;;  %v72_v5 = vld [vmem:[%s2994_s9 + $0x18] sm:$0xff]  ;;  %v1594_v7 = vld [vmem:[%s2996_s3 + $0x70] sm:$0xff] }
   0x3   :  { %1867 = vmatpush3.msra.mxu1 %v76_v0  ;;  %1882 = vmatprep.mubr.msk.f32.mxu1 %vm84_vm0, %v2349_v3  ;;  %v73_v4 = vld [vmem:[%s2994_s9 + $0x20] sm:$0xff]  ;;  %v1595_v6 = vld [vmem:[%s2996_s3 + $0x78] sm:$0xff]  ;;  %v71_v8 = vld [vmem:[%s2994_s9 + $0x10] sm:$0xff] }
   0x4   :  { %1868 = vmatprep.subr.mxu1 %v75_v1  ;;  %1932 = vmatprep.mubr.msk.f32.mxu0 %vm84_vm0, %v2349_v3  ;;  %v1593_v9 = vld [vmem:[%s2996_s3 + $0x68] sm:$0xff]  ;;  %v1592_v11 = vld [vmem:[%s2996_s3 + $0x60] sm:$0xff]  ;;  %v1591_v13 = vld [vmem:[%s2996_s3 + $0x58] sm:$0xff] }
   0x5   :  { %1869 = vmatpush3.msra.mxu1 %v75_v1  ;;  %1916 = vmatprep.subr.mxu0 %v1595_v6  ;;  %v70_v10 = vld [vmem:[%s2994_s9 + $0x8] sm:$0xff]  ;;  %v69_v12 = vld [vmem:[%s2994_s9] sm:$0xff]  ;;  %v2393_v15 = vld [vmem:[%s2995_s0 + $0x18] sm:$0xff] }
   0x6   :  { %1870 = vmatprep.subr.mxu1 %v74_v2  ;;  %1917 = vmatpush3.msra.mxu0 %v1595_v6  ;;  %v2388_v14 = vld [vmem:[%s2995_s0 + $0x8] sm:$0xff]  ;;  %v2398_v16 = vld [vmem:[%s2995_s0 + $0x10] sm:$0xff]  ;;  %v2413_v18 = vld [vmem:[%s2997_s1] sm:$0xff] }
   0x7   :  { %1871 = vmatpush3.msra.mxu1 %v74_v2  ;;  %1918 = vmatprep.subr.mxu0 %v1594_v7  ;;  %v1590_v17 = vld [vmem:[%s2996_s3 + $0x50] sm:$0xff]  ;;  %v1589_v19 = vld [vmem:[%s2996_s3 + $0x48] sm:$0xff]  ;;  %v2446_v22 = vld [vmem:[%s2997_s1 + $0x18] sm:$0xff] }
   0x8   :  { %1872 = vmatprep.subr.mxu1 %v73_v4  ;;  %1919 = vmatpush3.msra.mxu0 %v1594_v7  ;;  %v2428_v20 = vld [vmem:[%s2997_s1 + $0x8] sm:$0xff]  ;;  %v2434_v21 = vld [vmem:[%s2997_s1 + $0x10] sm:$0xff]  ;;  %v2452_v23 = vld [vmem:[%s2998_s2] sm:$0xff] }
   0x9   :  { %1873 = vmatpush3.msra.mxu1 %v73_v4  ;;  %1920 = vmatprep.subr.mxu0 %v1593_v9  ;;  %v2464_v24 = vld [vmem:[%s2998_s2 + $0x8] sm:$0xff]  ;;  %v384_v25 = vld [vmem:[%s2996_s3 + $0x38] sm:$0xff]  ;;  %v2473_v26 = vld [vmem:[%s2998_s2 + $0x10] sm:$0xff] }
   0xa   :  { %1874 = vmatprep.subr.mxu1 %v72_v5  ;;  %1921 = vmatpush3.msra.mxu0 %v1593_v9  ;;  %v383_v27 = vld [vmem:[%s2996_s3 + $0x30] sm:$0xff]  ;;  %v2486_v28 = vld [vmem:[%s2998_s2 + $0x18] sm:$0xff]  ;;  %v382_v29 = vld [vmem:[%s2996_s3 + $0x28] sm:$0xff] }
   0xb   :  { %1875 = vmatpush3.msra.mxu1 %v72_v5  ;;  %1922 = vmatprep.subr.mxu0 %v1592_v11  ;;  %v1588_v30 = vld [vmem:[%s2996_s3 + $0x40] sm:$0xff]  ;;  %v380_v32 = vld [vmem:[%s2996_s3 + $0x18] sm:$0xff]  ;;  %v379_v34 = vld [vmem:[%s2996_s3 + $0x10] sm:$0xff] }
   0xc   :  { %1876 = vmatprep.subr.mxu1 %v71_v8  ;;  %1923 = vmatpush3.msra.mxu0 %v1592_v11  ;;  %v381_v31 = vld [vmem:[%s2996_s3 + $0x20] sm:$0xff]  ;;  %v1611_v33 = vld [vmem:[%s2996_s3 + $0xb8] sm:$0xff]  ;;  %v1610_v35 = vld [vmem:[%s2996_s3 + $0xb0] sm:$0xff] }
   0xd   :  { %1877 = vmatpush3.msra.mxu1 %v71_v8  ;;  %1924 = vmatprep.subr.mxu0 %v1591_v13  ;;  %v378_v36 = vld [vmem:[%s2996_s3 + $0x8] sm:$0xff]  ;;  %v377_v38 = vld [vmem:[%s2996_s3] sm:$0xff]  ;;  %v1607_v40 = vld [vmem:[%s2996_s3 + $0x98] sm:$0xff] }
   0xe   :  { %1878 = vmatprep.subr.mxu1 %v70_v10  ;;  %1925 = vmatpush3.msra.mxu0 %v1591_v13  ;;  %v1609_v37 = vld [vmem:[%s2996_s3 + $0xa8] sm:$0xff]  ;;  %v1608_v39 = vld [vmem:[%s2996_s3 + $0xa0] sm:$0xff]  ;;  %v1606_v41 = vld [vmem:[%s2996_s3 + $0x90] sm:$0xff] }
   0xf   :  { %1879 = vmatpush3.msra.mxu1 %v70_v10  ;;  %1926 = vmatprep.subr.mxu0 %v1590_v17  ;;  %v1605_v42 = vld [vmem:[%s2996_s3 + $0x88] sm:$0xff]  ;;  %v1604_v43 = vld [vmem:[%s2996_s3 + $0x80] sm:$0xff]  ;;  %v2561_v57 = vld [vmem:[%s2999_s11 + $0x78] sm:$0xff] }
  0x10   :  { %1880 = vmatprep.subr.mxu1 %v69_v12  ;;  %1927 = vmatpush3.msra.mxu0 %v1590_v17  ;;  %v2570_v58 = vld [vmem:[%s2999_s11 + $0x70] sm:$0xff]  ;;  %v2579_v59 = vld [vmem:[%s2999_s11 + $0x68] sm:$0xff]  ;;  %v2588_v60 = vld [vmem:[%s2999_s11 + $0x60] sm:$0xff] }
  0x11   :  { %1881 = vmatpush3.msra.mxu1 %v69_v12  ;;  %1928 = vmatprep.subr.mxu0 %v1589_v19  ;;  %v2597_v61 = vld [vmem:[%s2999_s11 + $0x58] sm:$0xff]  ;;  %v2606_v62 = vld [vmem:[%s2999_s11 + $0x50] sm:$0xff]  ;;  %v2615_v63 = vld [vmem:[%s2999_s11 + $0x48] sm:$0xff] }
  0x12   :  { %1883 = vmatmul.mubr.msk.f32.vlgmr.msra.gmra.mxu1 %vm84_vm0, %v2388_v14  ;;  %1888 = vmatprep.subr.mxu1 %v2393_v15  ;;  %v2624_v0 = vld [vmem:[%s2999_s11 + $0x40] sm:$0xff]  ;;  %v2633_v1 = vld [vmem:[%s2999_s11 + $0x38] sm:$0xff]  ;;  %v2642_v2 = vld [vmem:[%s2999_s11 + $0x30] sm:$0xff] }
  0x13   :  { %1889 = vmatpush3.msra.mxu1 %v2393_v15  ;;  %1885 = vmatprep.mubr.msk.f32.mxu1 %vm84_vm0, %v2398_v16  ;;  %v2660_v4 = vld [vmem:[%s2999_s11 + $0x20] sm:$0xff]  ;;  %v2669_v5 = vld [vmem:[%s2999_s11 + $0x18] sm:$0xff]  ;;  %v2678_v6 = vld [vmem:[%s2999_s11 + $0x10] sm:$0xff] }
  0x14   :  { %1890 = vmatprep.subr.mxu1 %v2398_v16  ;;  %1929 = vmatpush3.msra.mxu0 %v1589_v19  ;;  %v2687_v7 = vld [vmem:[%s2999_s11 + $0x8] sm:$0xff]  ;;  %v2693_v8 = vld [vmem:[%s2999_s11] sm:$0xff] }
  0x15   :  { %1891 = vmatpush3.msra.mxu1 %v2398_v16  ;;  %1930 = vmatprep.subr.mxu0 %v1588_v30 }
  0x16   :  { %1886 = vmatmul.mubr.msk.f32.gmra.mxu1 %vm84_vm0, %v2393_v15  ;;  %1892 = vmatprep.subr.mxu1 %v2388_v14 }
  0x17   :  { %1893 = vmatpush3.msra.mxu1 %v2388_v14  ;;  %1896 = vmatprep.mubr.msk.f32.mxu1 %vm182_vm1, %v2413_v18 }
  0x18   :  { %1894 = vmatprep.subr.mxu1 %v2349_v3  ;;  %1931 = vmatpush3.msra.mxu0 %v1588_v30 }
  0x19   :  { %1895 = vmatpush3.msra.mxu1 %v2349_v3  ;;  %1933 = vmatmul.mubr.msk.f32.vlgmr.msra.gmra.mxu0 %vm84_vm0, %v2388_v14 }
  0x1a   :  { %1897 = vmatmul.mubr.msk.f32.vlgmr.msra.gmra.mxu1 %vm182_vm1, %v2428_v20  ;;  %1902 = vmatprep.subr.mxu1 %v2393_v15 }
  0x1b   :  { %1903 = vmatpush3.msra.mxu1 %v2393_v15  ;;  %1899 = vmatprep.mubr.msk.f32.mxu1 %vm182_vm1, %v2434_v21 }
  0x1c   :  { %1904 = vmatprep.subr.mxu1 %v2398_v16  ;;  %1960 = vmatprep.subr.mxu0 %v1611_v33 }
  0x1d   :  { %1905 = vmatpush3.msra.mxu1 %v2398_v16  ;;  %1961 = vmatpush3.msra.mxu0 %v1611_v33 }
  0x1e   :  { %1900 = vmatmul.mubr.msk.f32.gmra.mxu1 %vm182_vm1, %v2446_v22  ;;  %1906 = vmatprep.subr.mxu1 %v2388_v14 }
  0x1f   :  { %1907 = vmatpush3.msra.mxu1 %v2388_v14  ;;  %1910 = vmatprep.mubr.msk.f32.mxu1 %vm182_vm1, %v2452_v23 }
  0x20   :  { %1908 = vmatprep.subr.mxu1 %v2349_v3  ;;  %1962 = vmatprep.subr.mxu0 %v1610_v35 }
  0x21   :  { %1909 = vmatpush3.msra.mxu1 %v2349_v3  ;;  %1963 = vmatpush3.msra.mxu0 %v1610_v35  ;;  %v2651_v3 = vld [vmem:[%s2999_s11 + $0x28] sm:$0xff] }
  0x22   :  { %1911 = vmatmul.mubr.msk.f32.vlgmr.msra.gmra.mxu1 %vm182_vm1, %v2464_v24  ;;  %1938 = vmatprep.subr.mxu1 %v384_v25 }
  0x23   :  { %1913 = vmatprep.mubr.msk.f32.mxu1 %vm182_vm1, %v2473_v26  ;;  %1939 = vmatpush3.msra.mxu1 %v384_v25 }
  0x24   :  { %1940 = vmatprep.subr.mxu1 %v383_v27  ;;  %1964 = vmatprep.subr.mxu0 %v1609_v37 }
  0x25   :  { %1941 = vmatpush3.msra.mxu1 %v383_v27  ;;  %1965 = vmatpush3.msra.mxu0 %v1609_v37 }
  0x26   :  { %1914 = vmatmul.mubr.msk.f32.gmra.mxu1 %vm182_vm1, %v2486_v28  ;;  %1942 = vmatprep.subr.mxu1 %v382_v29 }
  0x27   :  { %1943 = vmatpush3.msra.mxu1 %v382_v29  ;;  %1966 = vmatprep.subr.mxu0 %v1608_v39 }
  0x28   :  { %1944 = vmatprep.subr.mxu1 %v381_v31  ;;  %1967 = vmatpush3.msra.mxu0 %v1608_v39 }
  0x29   :  { %1945 = vmatpush3.msra.mxu1 %v381_v31  ;;  %1968 = vmatprep.subr.mxu0 %v1607_v40 }
  0x2a   :  { %1946 = vmatprep.subr.mxu1 %v380_v32  ;;  %1935 = vmatprep.mubr.msk.f32.mxu0 %vm84_vm0, %v2398_v16 }
  0x2b   :  { %1947 = vmatpush3.msra.mxu1 %v380_v32  ;;  %1969 = vmatpush3.msra.mxu0 %v1607_v40 }
  0x2c   :  { %1948 = vmatprep.subr.mxu1 %v379_v34  ;;  %1936 = vmatmul.mubr.msk.f32.gmra.mxu0 %vm84_vm0, %v2393_v15 }
  0x2d   :  { %1949 = vmatpush3.msra.mxu1 %v379_v34  ;;  %1970 = vmatprep.subr.mxu0 %v1606_v41 }
  0x2e   :  { %1950 = vmatprep.subr.mxu1 %v378_v36  ;;  %1971 = vmatpush3.msra.mxu0 %v1606_v41 }
  0x2f   :  { %1951 = vmatpush3.msra.mxu1 %v378_v36  ;;  %1972 = vmatprep.subr.mxu0 %v1605_v42 }
  0x30   :  { %1952 = vmatprep.subr.mxu1 %v377_v38  ;;  %1973 = vmatpush3.msra.mxu0 %v1605_v42 }
  0x31   :  { %1953 = vmatpush3.msra.mxu1 %v377_v38  ;;  %1974 = vmatprep.subr.mxu0 %v1604_v43 }
  0x32   :  { %1975 = vmatpush3.msra.mxu0 %v1604_v43  ;;  %1982 = vmatprep.subr.mxu1 %v2270_v56 }
  0x33   :  { %2017 = vmatprep.subr.mxu0 %v2270_v56 }
  0xd2   :  { %v2541_v44 = vpop.f32.mrf.mxu1 }
  0xd4   :  { %v2543_v45 = vpop.f32.mrf.mxu1 }
  0xd6   :  { %v2545_v46 = vpop.f32.mrf.mxu1 }
  0xd8   :  { %v2547_v47 = vpop.f32.mrf.mxu1 }
  0xd9   :  { %v1934_v9 = vpop.f32.mrf.mxu0 }
  0xda   :  { %v1898_v48 = vpop.f32.mrf.mxu1 }
  0xdb   :  { %v460_v10 = vpop.f32.mrf.mxu0 }
  0xdc   :  { %v261_v49 = vpop.f32.mrf.mxu1 }
  0xdd   :  { %1954 = vmatprep.mubr.msk.f32.mxu1 %vm84_vm0, %v261_v49 }
  0xde   :  { %v1901_v50 = vpop.f32.mrf.mxu1  ;;  %1955 = vmatmul.mubr.msk.f32.vlgmr.msra.gmra.mxu1 %vm84_vm0, %v1898_v48 }
  0xdf   :  { %1983 = vmatpush3.msra.mxu1 %v2561_v57 }
  0xe0   :  { %v271_v51 = vpop.f32.mrf.mxu1  ;;  %1984 = vmatprep.subr.mxu1 %v2270_v56 }
  0xe1   :  { %1957 = vmatprep.mubr.msk.f32.mxu1 %vm84_vm0, %v271_v51  ;;  %1985 = vmatpush3.msra.mxu1 %v2570_v58 }
  0xe2   :  { %v1912_v52 = vpop.f32.mrf.mxu1  ;;  %1958 = vmatmul.mubr.msk.f32.gmra.mxu1 %vm84_vm0, %v1901_v50  ;;  %1986 = vmatprep.subr.mxu1 %v2270_v56 }
  0xe3   :  { %1987 = vmatpush3.msra.mxu1 %v2579_v59  ;;  %2014 = vmatprep.mubr.msk.f32.mxu1 %vm2271_vm2, %v2270_v56 }
  0xe4   :  { %v358_v53 = vpop.f32.mrf.mxu1  ;;  %1988 = vmatprep.subr.mxu1 %v2270_v56 }
  0xe5   :  { %1976 = vmatprep.mubr.msk.f32.mxu0 %vm84_vm0, %v358_v53  ;;  %1989 = vmatpush3.msra.mxu1 %v2588_v60 }
  0xe6   :  { %v1915_v54 = vpop.f32.mrf.mxu1  ;;  %1977 = vmatmul.mubr.msk.f32.vlgmr.msra.gmra.mxu0 %vm84_vm0, %v1912_v52  ;;  %1990 = vmatprep.subr.mxu1 %v2270_v56 }
  0xe7   :  { %2018 = vmatpush3.msra.mxu0 %v2561_v57  ;;  %1991 = vmatpush3.msra.mxu1 %v2597_v61 }
  0xe8   :  { %v368_v55 = vpop.f32.mrf.mxu1  ;;  %2019 = vmatprep.subr.mxu0 %v2270_v56  ;;  %1992 = vmatprep.subr.mxu1 %v2270_v56 }
  0xe9   :  { %1979 = vmatprep.mubr.msk.f32.mxu0 %vm84_vm0, %v368_v55  ;;  %2020 = vmatpush3.msra.mxu0 %v2570_v58 }
  0xea   :  { %1980 = vmatmul.mubr.msk.f32.gmra.mxu0 %vm84_vm0, %v1915_v54  ;;  %2021 = vmatprep.subr.mxu0 %v2270_v56 }
  0xeb   :  { %2022 = vmatpush3.msra.mxu0 %v2579_v59  ;;  %1993 = vmatpush3.msra.mxu1 %v2606_v62 }
  0xec   :  { %2023 = vmatprep.subr.mxu0 %v2270_v56  ;;  %1994 = vmatprep.subr.mxu1 %v2270_v56  ;;  %v1937_v12 = vpop.f32.mrf.mxu0 }
  0xed   :  { %2024 = vmatpush3.msra.mxu0 %v2588_v60  ;;  %1995 = vmatpush3.msra.mxu1 %v2615_v63 }
  0xee   :  { %2025 = vmatprep.subr.mxu0 %v2270_v56  ;;  %1996 = vmatprep.subr.mxu1 %v2270_v56  ;;  %v470_v14 = vpop.f32.mrf.mxu0 }
  0xef   :  { %2026 = vmatpush3.msra.mxu0 %v2597_v61  ;;  %1997 = vmatpush3.msra.mxu1 %v2624_v0 }
  0xf0   :  { %2027 = vmatprep.subr.mxu0 %v2270_v56  ;;  %1998 = vmatprep.subr.mxu1 %v2270_v56 }
  0xf1   :  { %2028 = vmatpush3.msra.mxu0 %v2606_v62  ;;  %1999 = vmatpush3.msra.mxu1 %v2633_v1 }
  0xf2   :  { %2029 = vmatprep.subr.mxu0 %v2270_v56  ;;  %2000 = vmatprep.subr.mxu1 %v2270_v56 }
  0xf3   :  { %2030 = vmatpush3.msra.mxu0 %v2615_v63  ;;  %2001 = vmatpush3.msra.mxu1 %v2642_v2 }
  0xf4   :  { %2031 = vmatprep.subr.mxu0 %v2270_v56  ;;  %2002 = vmatprep.subr.mxu1 %v2270_v56 }
  0xf5   :  { %2032 = vmatpush3.msra.mxu0 %v2624_v0  ;;  %2003 = vmatpush3.msra.mxu1 %v2651_v3 }
  0xf6   :  { %2033 = vmatprep.subr.mxu0 %v2270_v56  ;;  %2004 = vmatprep.subr.mxu1 %v2270_v56 }
  0xf7   :  { %2034 = vmatpush3.msra.mxu0 %v2633_v1  ;;  %2005 = vmatpush3.msra.mxu1 %v2660_v4 }
  0xf8   :  { %2035 = vmatprep.subr.mxu0 %v2270_v56  ;;  %2006 = vmatprep.subr.mxu1 %v2270_v56 }
  0xf9   :  { %2036 = vmatpush3.msra.mxu0 %v2642_v2  ;;  %2007 = vmatpush3.msra.mxu1 %v2669_v5 }
  0xfa   :  { %2037 = vmatprep.subr.mxu0 %v2270_v56  ;;  %2008 = vmatprep.subr.mxu1 %v2270_v56 }
  0xfb   :  { %2038 = vmatpush3.msra.mxu0 %v2651_v3  ;;  %2009 = vmatpush3.msra.mxu1 %v2678_v6 }
  0xfc   :  { %2039 = vmatprep.subr.mxu0 %v2270_v56  ;;  %2010 = vmatprep.subr.mxu1 %v2270_v56 }
  0xfd   :  { %2040 = vmatpush3.msra.mxu0 %v2660_v4  ;;  %2011 = vmatpush3.msra.mxu1 %v2687_v7 }
  0xfe   :  { %2041 = vmatprep.subr.mxu0 %v2270_v56  ;;  %2012 = vmatprep.subr.mxu1 %v2270_v56 }
  0xff   :  { %2042 = vmatpush3.msra.mxu0 %v2669_v5  ;;  %2013 = vmatpush3.msra.mxu1 %v2693_v8 }
 0x100   :  { %2043 = vmatprep.subr.mxu0 %v2270_v56  ;;  %2049 = vmatprep.mubr.msk.f32.mxu0 %vm2271_vm2, %v2270_v56 }
 0x101   :  { %2044 = vmatpush3.msra.mxu0 %v2678_v6 }
 0x102   :  { %2045 = vmatprep.subr.mxu0 %v2270_v56 }
 0x103   :  { %2046 = vmatpush3.msra.mxu0 %v2687_v7 }
 0x104   :  { %2047 = vmatprep.subr.mxu0 %v2270_v56 }
 0x105   :  { %2048 = vmatpush3.msra.mxu0 %v2693_v8 }
 0x19e   :  { %v1956_v11 = vpop.f32.mrf.mxu1 }
 0x19f   :  { %v563_v17 = vadd.f32 %v1956_v11, %v1934_v9 }
 0x1a0   :  { %v557_v13 = vpop.f32.mrf.mxu1 }
 0x1a1   :  { %v558_v19 = vadd.f32 %v557_v13, %v460_v10 }
 0x1a2   :  { %v1959_v15 = vpop.f32.mrf.mxu1 }
 0x1a3   :  { %v573_v32 = vadd.f32 %v1959_v15, %v1937_v12 }
 0x1a4   :  { %v567_v25 = vpop.f32.mrf.mxu1 }
 0x1a5   :  { %v568_v33 = vadd.f32 %v567_v25, %v470_v14  ;;  %v1636_v25 = vld [vmem:[%s3000_s6 + $0xd8] sm:$0xff] }
 0x1a6   :  { %v1978_v16 = vpop.f32.mrf.mxu0 }
 0x1a7   :  { %v2705_v29 = vadd.f32 %v1978_v16, %v563_v17  ;;  %v1640_v16 = vld [vmem:[%s3000_s6 + $0xf8] sm:$0xff]  ;;  %v1639_v17 = vld [vmem:[%s3000_s6 + $0xf0] sm:$0xff] }
 0x1a8   :  { %v663_v27 = vpop.f32.mrf.mxu0  ;;  %2080 = vmatprep.subr.mxu0 %v1640_v16 }
 0x1a9   :  { %v2707_v30 = vadd.f32 %v663_v27, %v558_v19  ;;  %v698_v36 = vmul.f32 %v2705_v29, %v2705_v29  ;;  %v1638_v19 = vld [vmem:[%s3000_s6 + $0xe8] sm:$0xff]  ;;  %v1635_v27 = vld [vmem:[%s3000_s6 + $0xd0] sm:$0xff] }
 0x1aa   :  { %v1981_v31 = vpop.f32.mrf.mxu0 }
 0x1ab   :  { %v697_v34 = vmul.f32 %v2707_v30, %v2707_v30  ;;  %v688_v37 = vadd.f32 %v2705_v29, %v2707_v30  ;;  %v2715_v38 = vadd.f32 %v1981_v31, %v573_v32  ;;  %v1634_v31 = vld [vmem:[%s3000_s6 + $0xc8] sm:$0xff]  ;;  %v1633_v32 = vld [vmem:[%s3000_s6 + $0xc0] sm:$0xff] }
 0x1ac   :  { %v673_v35 = vpop.f32.mrf.mxu0 }
 0x1ad   :  { %v2717_v39 = vadd.f32 %v673_v35, %v568_v33  ;;  %v701_v40 = vadd.f32 %v698_v36, %v697_v34  ;;  %v700_v43 = vmul.f32 %v2715_v38, %v2715_v38  ;;  %v1632_v33 = vld [vmem:[%s3000_s6 + $0xb8] sm:$0xff]  ;;  %v1631_v34 = vld [vmem:[%s3000_s6 + $0xb0] sm:$0xff]  ;;  %v1630_v35 = vld [vmem:[%s3000_s6 + $0xa8] sm:$0xff] }
 0x1ae   :  { %v1629_v36 = vld [vmem:[%s3000_s6 + $0xa0] sm:$0xff] }
 0x1af   :  { %v689_v41 = vadd.f32 %v688_v37, %v2717_v39  ;;  %v699_v42 = vmul.f32 %v2717_v39, %v2717_v39  ;;  %v1628_v37 = vld [vmem:[%s3000_s6 + $0x98] sm:$0xff] }
 0x1b1   :  { %v690_v48 = vadd.f32 %v689_v41, %v2715_v38  ;;  %v702_v49 = vadd.f32 %v701_v40, %v699_v42  ;;  %v1627_v40 = vld [vmem:[%s3000_s6 + $0x90] sm:$0xff]  ;;  %v1626_v41 = vld [vmem:[%s3000_s6 + $0x88] sm:$0xff]  ;;  %v1625_v42 = vld [vmem:[%s3000_s6 + $0x80] sm:$0xff] }
 0x1b3   :  { %v691_v50 = vrot.slane %v690_v48, 4  ;;  %v703_v51 = vadd.f32 %v702_v49, %v700_v43  ;;  %v1656_v43 = vld [vmem:[%s3000_s6 + $0x178] sm:$0xff] }
 0x1b5   :  { %v692_v52 = vadd.f32 %v691_v50, %v690_v48  ;;  %v704_v53 = vrot.slane %v703_v51, 4 }
 0x1b7   :  { %v693_v54 = vrot.slane %v692_v52, 2  ;;  %v705_v55 = vadd.f32 %v704_v53, %v703_v51 }
 0x1b9   :  { %v694_v9 = vadd.f32 %v693_v54, %v692_v52  ;;  %v706_v10 = vrot.slane %v705_v55, 2 }
 0x1bb   :  { %v695_v11 = vrot.slane %v694_v9, 1  ;;  %v707_v12 = vadd.f32 %v706_v10, %v705_v55  ;;  %v852_v55 = vlaneseq }
 0x1bd   :  { %v696_v13 = vadd.f32 %v695_v11, %v694_v9  ;;  %v708_v14 = vrot.slane %v707_v12, 1  ;;  %v853_v9 = vshrl.u32 %v852_v55, 7  ;;  %v1649_v55 = vld [vmem:[%s3000_s6 + $0x140] sm:$0xff] }
 0x1bf   :  { %2015 = vmatmul.mubr.f32.vlgmr.msra.gmra.mxu1 %v696_v13  ;;  %v709_v15 = vadd.f32 %v708_v14, %v707_v12  ;;  %v2778_v10 = vsub.s32 0, %v853_v9  ;;  %v686_v12 = vld [vmem:[%s3001_s4] sm:$0x1]  ;;  %v1058_v9 = vld [vmem:[%s3000_s6 + $0x18] sm:$0xff] }
 0x1c0   :  { %2060 = vmatprep.mubr.msk.f32.mxu1 %vm182_vm1, %v2413_v18  ;;  %v1637_v18 = vld [vmem:[%s3000_s6 + $0xe0] sm:$0xff] }
 0x1c1   :  { %2050 = vmatmul.mubr.f32.vlgmr.msra.gmra.mxu0 %v709_v15 }
 0x1c2   :  { %2081 = vmatpush3.msra.mxu0 %v1640_v16 }
 0x1c3   :  { %2082 = vmatprep.subr.mxu0 %v1639_v17 }
 0x1c4   :  { %2083 = vmatpush3.msra.mxu0 %v1639_v17 }
 0x1c5   :  { %2084 = vmatprep.subr.mxu0 %v1638_v19 }
 0x1c6   :  { %2085 = vmatpush3.msra.mxu0 %v1638_v19 }
 0x1c7   :  { %2086 = vmatprep.subr.mxu0 %v1637_v18 }
 0x1c8   :  { %2087 = vmatpush3.msra.mxu0 %v1637_v18 }
 0x1c9   :  { %2088 = vmatprep.subr.mxu0 %v1636_v25 }
 0x1ca   :  { %2089 = vmatpush3.msra.mxu0 %v1636_v25  ;;  %v1616_v25 = vld [vmem:[%s3002_s5] ss:$0 sm:$0xff] }
 0x1cb   :  { %2090 = vmatprep.subr.mxu0 %v1635_v27 }
 0x1cc   :  { %2091 = vmatpush3.msra.mxu0 %v1635_v27 }
 0x1cd   :  { %2092 = vmatprep.subr.mxu0 %v1634_v31 }
 0x1ce   :  { %2093 = vmatpush3.msra.mxu0 %v1634_v31 }
 0x1cf   :  { %2094 = vmatprep.subr.mxu0 %v1633_v32 }
 0x1d0   :  { %2095 = vmatpush3.msra.mxu0 %v1633_v32 }
 0x1d1   :  { %2096 = vmatprep.subr.mxu0 %v1632_v33 }
 0x1d2   :  { %2097 = vmatpush3.msra.mxu0 %v1632_v33 }
 0x1d3   :  { %2098 = vmatprep.subr.mxu0 %v1631_v34 }
 0x1d4   :  { %2099 = vmatpush3.msra.mxu0 %v1631_v34 }
 0x1d5   :  { %2100 = vmatprep.subr.mxu0 %v1630_v35 }
 0x1d6   :  { %2101 = vmatpush3.msra.mxu0 %v1630_v35 }
 0x1d7   :  { %2102 = vmatprep.subr.mxu0 %v1629_v36 }
 0x1d8   :  { %2103 = vmatpush3.msra.mxu0 %v1629_v36 }
 0x1d9   :  { %2104 = vmatprep.subr.mxu0 %v1628_v37 }
 0x1da   :  { %2105 = vmatpush3.msra.mxu0 %v1628_v37 }
 0x1db   :  { %2106 = vmatprep.subr.mxu0 %v1627_v40 }
 0x1dc   :  { %2107 = vmatpush3.msra.mxu0 %v1627_v40 }
 0x1dd   :  { %2108 = vmatprep.subr.mxu0 %v1626_v41 }
 0x1de   :  { %2109 = vmatpush3.msra.mxu0 %v1626_v41  ;;  %v1654_v41 = vld [vmem:[%s3000_s6 + $0x168] sm:$0xff] }
 0x1df   :  { %2110 = vmatprep.subr.mxu0 %v1625_v42 }
 0x1e0   :  { %2111 = vmatpush3.msra.mxu0 %v1625_v42  ;;  %v1653_v42 = vld [vmem:[%s3000_s6 + $0x160] sm:$0xff] }
 0x1e1   :  { %2156 = vmatprep.subr.mxu0 %v1656_v43 }
 0x27f   :  { %v776_v48 = vpop.f32.mrf.mxu1 }
 0x280   :  { %v850_v49 = vmul.f32 %v776_v48, %v776_v48  ;;  %v855_v11 = vrot.slane %v776_v48, %v2778_v10  ;;  %v1650_v48 = vld [vmem:[%s3000_s6 + $0x148] sm:$0xff] }
 0x281   :  { %v2016_v50 = vpop.f32.mrf.mxu1  ;;  %v846_v51 = vpop.f32.mrf.mxu0 }
 0x282   :  { %v851_v52 = vsub.f32 %v846_v51, %v850_v49  ;;  %v856_v15 = vsub.f32 %v2707_v30, %v855_v11  ;;  %v857_v16 = vsub.f32 %v2705_v29, %v855_v11  ;;  %v858_v17 = vsub.f32 %v2717_v39, %v855_v11  ;;  %v1655_v39 = vld [vmem:[%s3000_s6 + $0x170] sm:$0xff]  ;;  %v1063_v50 = vld [vmem:[%s3000_s6 + $0x40] sm:$0xff]  ;;  %v1062_v51 = vld [vmem:[%s3000_s6 + $0x38] sm:$0xff] }
 0x283   :  { %v2051_v53 = vpop.f32.mrf.mxu0  ;;  %v859_v19 = vsub.f32 %v2715_v38, %v855_v11  ;;  %v1065_v49 = vld [vmem:[%s3000_s6 + $0x50] sm:$0xff]  ;;  %v1648_v11 = vld [vmem:[%s3000_s6 + $0x138] sm:$0xff] }
 0x284   :  { %v860_v54 = vadd.f32 1e-05, %v851_v52  ;;  %v1061_v52 = vld [vmem:[%s3000_s6 + $0x30] sm:$0xff]  ;;  %v1060_v53 = vld [vmem:[%s3000_s6 + $0x28] sm:$0xff] }
 0x286   :  { %2266 = vrsqrt.f32 %v860_v54  ;;  %v1059_v54 = vld [vmem:[%s3000_s6 + $0x20] sm:$0xff] }
 0x293   :  { %v2267_v13 = vpop.eup %2266 }
 0x294   :  { %v862_v14 = vmul.f32 %v2267_v13, %v686_v12  ;;  %v1057_v12 = vld [vmem:[%s3000_s6 + $0x10] sm:$0xff] }
 0x295   :  { %v1647_v13 = vld [vmem:[%s3000_s6 + $0x130] sm:$0xff] }
 0x296   :  { %v866_v18 = vrot.slane %v862_v14, %v2778_v10  ;;  %v1056_v14 = vld [vmem:[%s3000_s6 + $0x8] sm:$0xff] }
 0x298   :  { %v870_v27 = vmul.f32 %v866_v18, %v859_v19  ;;  %v867_v31 = vmul.f32 %v866_v18, %v856_v15  ;;  %v868_v32 = vmul.f32 %v866_v18, %v857_v16  ;;  %v869_v33 = vmul.f32 %v866_v18, %v858_v17  ;;  %v1646_v15 = vld [vmem:[%s3000_s6 + $0x128] sm:$0xff]  ;;  %v1055_v16 = vld [vmem:[%s3000_s6] sm:$0xff]  ;;  %v1644_v19 = vld [vmem:[%s3000_s6 + $0x118] sm:$0xff] }
 0x299   :  { %v1645_v17 = vld [vmem:[%s3000_s6 + $0x120] sm:$0xff]  ;;  %v1643_v18 = vld [vmem:[%s3000_s6 + $0x110] sm:$0xff] }
 0x29a   :  { %v880_v34 = vadd.f32 %v1616_v25, %v870_v27  ;;  %v877_v35 = vadd.f32 %v1616_v25, %v867_v31  ;;  %v878_v36 = vadd.f32 %v1616_v25, %v868_v32  ;;  %v879_v30 = vadd.f32 %v1616_v25, %v869_v33  ;;  %v1642_v25 = vld [vmem:[%s3000_s6 + $0x108] sm:$0xff]  ;;  %v1641_v27 = vld [vmem:[%s3000_s6 + $0x100] sm:$0xff] }
 0x29c   :  { %v884_v37 = vmax.f32 %v880_v34, 0.0  ;;  %v881_v29 = vmax.f32 %v877_v35, 0.0  ;;  %v882_v40 = vmax.f32 %v878_v36, 0.0  ;;  %v883_v38 = vmax.f32 %v879_v30, 0.0 }
 0x29e   :  { %2052 = vmatprep.subr.mxu1 %v884_v37  ;;  %2112 = vmatprep.mubr.f32.mxu0 %v881_v29 }
 0x29f   :  { %2053 = vmatpush3.msra.mxu1 %v884_v37  ;;  %2113 = vmatmul.mubr.f32.vlgmr.msra.gmra.mxu0 %v882_v40 }
 0x2a0   :  { %2054 = vmatprep.subr.mxu1 %v883_v38  ;;  %2115 = vmatprep.mubr.f32.mxu0 %v883_v38 }
 0x2a1   :  { %2055 = vmatpush3.msra.mxu1 %v883_v38  ;;  %2157 = vmatpush3.msra.mxu0 %v1656_v43  ;;  %v1068_v43 = vld [vmem:[%s3000_s6 + $0x68] sm:$0xff] }
 0x2a2   :  { %2056 = vmatprep.subr.mxu1 %v882_v40  ;;  %2158 = vmatprep.subr.mxu0 %v1655_v39 }
 0x2a3   :  { %2057 = vmatpush3.msra.mxu1 %v882_v40  ;;  %2116 = vmatmul.mubr.f32.gmra.mxu0 %v884_v37 }
 0x2a4   :  { %2058 = vmatprep.subr.mxu1 %v881_v29  ;;  %2159 = vmatpush3.msra.mxu0 %v1655_v39 }
 0x2a5   :  { %2059 = vmatpush3.msra.mxu1 %v881_v29  ;;  %2160 = vmatprep.subr.mxu0 %v1654_v41 }
 0x2a6   :  { %2061 = vmatmul.mubr.msk.f32.vlgmr.msra.gmra.mxu1 %vm182_vm1, %v2428_v20  ;;  %2066 = vmatprep.subr.mxu1 %v884_v37  ;;  %v1652_v20 = vld [vmem:[%s3000_s6 + $0x158] sm:$0xff] }
 0x2a7   :  { %2067 = vmatpush3.msra.mxu1 %v884_v37  ;;  %2063 = vmatprep.mubr.msk.f32.mxu1 %vm182_vm1, %v2434_v21  ;;  %v1070_v21 = vld [vmem:[%s3000_s6 + $0x78] sm:$0xff] }
 0x2a8   :  { %2068 = vmatprep.subr.mxu1 %v883_v38  ;;  %2161 = vmatpush3.msra.mxu0 %v1654_v41 }
 0x2a9   :  { %2069 = vmatpush3.msra.mxu1 %v883_v38  ;;  %2162 = vmatprep.subr.mxu0 %v1653_v42 }
 0x2aa   :  { %2064 = vmatmul.mubr.msk.f32.gmra.mxu1 %vm182_vm1, %v2446_v22  ;;  %2070 = vmatprep.subr.mxu1 %v882_v40  ;;  %v1069_v22 = vld [vmem:[%s3000_s6 + $0x70] sm:$0xff] }
 0x2ab   :  { %2071 = vmatpush3.msra.mxu1 %v882_v40  ;;  %2074 = vmatprep.mubr.msk.f32.mxu1 %vm182_vm1, %v2452_v23  ;;  %v1651_v23 = vld [vmem:[%s3000_s6 + $0x150] sm:$0xff] }
 0x2ac   :  { %2072 = vmatprep.subr.mxu1 %v881_v29  ;;  %2163 = vmatpush3.msra.mxu0 %v1653_v42 }
 0x2ad   :  { %2073 = vmatpush3.msra.mxu1 %v881_v29  ;;  %2164 = vmatprep.subr.mxu0 %v1652_v20 }
 0x2ae   :  { %2075 = vmatmul.mubr.msk.f32.vlgmr.msra.gmra.mxu1 %vm182_vm1, %v2464_v24  ;;  %2118 = vmatprep.subr.mxu1 %v1070_v21  ;;  %v1067_v24 = vld [vmem:[%s3000_s6 + $0x60] sm:$0xff] }
 0x2af   :  { %2077 = vmatprep.mubr.msk.f32.mxu1 %vm182_vm1, %v2473_v26  ;;  %2119 = vmatpush3.msra.mxu1 %v1070_v21  ;;  %v1066_v26 = vld [vmem:[%s3000_s6 + $0x58] sm:$0xff] }
 0x2b0   :  { %2120 = vmatprep.subr.mxu1 %v1069_v22  ;;  %2165 = vmatpush3.msra.mxu0 %v1652_v20 }
 0x2b1   :  { %2121 = vmatpush3.msra.mxu1 %v1069_v22  ;;  %2166 = vmatprep.subr.mxu0 %v1651_v23 }
 0x2b2   :  { %2078 = vmatmul.mubr.msk.f32.gmra.mxu1 %vm182_vm1, %v2486_v28  ;;  %2122 = vmatprep.subr.mxu1 %v1068_v43  ;;  %v1064_v28 = vld [vmem:[%s3000_s6 + $0x48] sm:$0xff] }
 0x2b3   :  { %2123 = vmatpush3.msra.mxu1 %v1068_v43  ;;  %2167 = vmatpush3.msra.mxu0 %v1651_v23 }
 0x2b4   :  { %2124 = vmatprep.subr.mxu1 %v1067_v24  ;;  %2168 = vmatprep.subr.mxu0 %v1650_v48 }
 0x2b5   :  { %2125 = vmatpush3.msra.mxu1 %v1067_v24  ;;  %2169 = vmatpush3.msra.mxu0 %v1650_v48 }
 0x2b6   :  { %2126 = vmatprep.subr.mxu1 %v1066_v26  ;;  %2170 = vmatprep.subr.mxu0 %v1649_v55 }
 0x2b7   :  { %2127 = vmatpush3.msra.mxu1 %v1066_v26  ;;  %2171 = vmatpush3.msra.mxu0 %v1649_v55 }
 0x2b8   :  { %2128 = vmatprep.subr.mxu1 %v1065_v49  ;;  %2172 = vmatprep.subr.mxu0 %v1648_v11 }
 0x2b9   :  { %2129 = vmatpush3.msra.mxu1 %v1065_v49  ;;  %2173 = vmatpush3.msra.mxu0 %v1648_v11 }
 0x2ba   :  { %2130 = vmatprep.subr.mxu1 %v1064_v28  ;;  %2174 = vmatprep.subr.mxu0 %v1647_v13 }
 0x2bb   :  { %2131 = vmatpush3.msra.mxu1 %v1064_v28  ;;  %2175 = vmatpush3.msra.mxu0 %v1647_v13 }
 0x2bc   :  { %2132 = vmatprep.subr.mxu1 %v1063_v50  ;;  %2176 = vmatprep.subr.mxu0 %v1646_v15 }
 0x2bd   :  { %2133 = vmatpush3.msra.mxu1 %v1063_v50  ;;  %2177 = vmatpush3.msra.mxu0 %v1646_v15 }
 0x2be   :  { %2134 = vmatprep.subr.mxu1 %v1062_v51  ;;  %2178 = vmatprep.subr.mxu0 %v1645_v17 }
 0x2bf   :  { %2135 = vmatpush3.msra.mxu1 %v1062_v51  ;;  %2179 = vmatpush3.msra.mxu0 %v1645_v17 }
 0x2c0   :  { %2136 = vmatprep.subr.mxu1 %v1061_v52  ;;  %2180 = vmatprep.subr.mxu0 %v1644_v19 }
 0x2c1   :  { %2137 = vmatpush3.msra.mxu1 %v1061_v52  ;;  %2181 = vmatpush3.msra.mxu0 %v1644_v19 }
 0x2c2   :  { %2138 = vmatprep.subr.mxu1 %v1060_v53  ;;  %2182 = vmatprep.subr.mxu0 %v1643_v18 }
 0x2c3   :  { %2139 = vmatpush3.msra.mxu1 %v1060_v53  ;;  %2183 = vmatpush3.msra.mxu0 %v1643_v18 }
 0x2c4   :  { %2140 = vmatprep.subr.mxu1 %v1059_v54  ;;  %2184 = vmatprep.subr.mxu0 %v1642_v25 }
 0x2c5   :  { %2141 = vmatpush3.msra.mxu1 %v1059_v54  ;;  %2185 = vmatpush3.msra.mxu0 %v1642_v25 }
 0x2c6   :  { %2142 = vmatprep.subr.mxu1 %v1058_v9  ;;  %2186 = vmatprep.subr.mxu0 %v1641_v27 }
 0x2c7   :  { %2143 = vmatpush3.msra.mxu1 %v1058_v9  ;;  %2187 = vmatpush3.msra.mxu0 %v1641_v27  ;;  %v1364_v27 = vld [vmem:[%s3003_s7] sm:$0x1] }
 0x2c8   :  { %2144 = vmatprep.subr.mxu1 %v1057_v12  ;;  %2229 = vmatprep.subr.mxu0 %v2270_v56 }
 0x2c9   :  { %2145 = vmatpush3.msra.mxu1 %v1057_v12 }
 0x2ca   :  { %2146 = vmatprep.subr.mxu1 %v1056_v14 }
 0x2cb   :  { %2147 = vmatpush3.msra.mxu1 %v1056_v14 }
 0x2cc   :  { %2148 = vmatprep.subr.mxu1 %v1055_v16 }
 0x2cd   :  { %2149 = vmatpush3.msra.mxu1 %v1055_v16 }
 0x2ce   :  { %2194 = vmatprep.subr.mxu1 %v2270_v56 }
 0x366   :  { %v2062_v31 = vpop.f32.mrf.mxu1 }
 0x368   :  { %v951_v32 = vpop.f32.mrf.mxu1 }
 0x369   :  { %2150 = vmatprep.mubr.f32.mxu1 %v951_v32 }
 0x36a   :  { %v2065_v33 = vpop.f32.mrf.mxu1  ;;  %2151 = vmatmul.mubr.f32.vlgmr.msra.gmra.mxu1 %v2062_v31 }
 0x36b   :  { %2195 = vmatpush3.msra.mxu1 %v2561_v57 }
 0x36c   :  { %v961_v34 = vpop.f32.mrf.mxu1  ;;  %2196 = vmatprep.subr.mxu1 %v2270_v56 }
 0x36d   :  { %2153 = vmatprep.mubr.f32.mxu1 %v961_v34  ;;  %2197 = vmatpush3.msra.mxu1 %v2570_v58  ;;  %v1575_v34 = vld [vmem:[%s3004_s10] ss:$0 sm:$0xff] }
 0x36e   :  { %v2076_v35 = vpop.f32.mrf.mxu1  ;;  %2154 = vmatmul.mubr.f32.gmra.mxu1 %v2065_v33  ;;  %2198 = vmatprep.subr.mxu1 %v2270_v56 }
 0x36f   :  { %2199 = vmatpush3.msra.mxu1 %v2579_v59  ;;  %2226 = vmatprep.mubr.msk.f32.mxu1 %vm2271_vm2, %v2270_v56 }
 0x370   :  { %v1036_v36 = vpop.f32.mrf.mxu1  ;;  %2200 = vmatprep.subr.mxu1 %v2270_v56 }
 0x371   :  { %2188 = vmatprep.mubr.f32.mxu0 %v1036_v36  ;;  %2201 = vmatpush3.msra.mxu1 %v2588_v60 }
 0x372   :  { %v2079_v30 = vpop.f32.mrf.mxu1  ;;  %2189 = vmatmul.mubr.f32.vlgmr.msra.gmra.mxu0 %v2076_v35  ;;  %2202 = vmatprep.subr.mxu1 %v2270_v56 }
 0x373   :  { %2230 = vmatpush3.msra.mxu0 %v2561_v57  ;;  %2203 = vmatpush3.msra.mxu1 %v2597_v61  ;;  %v2114_v57 = vpop.f32.mrf.mxu0 }
 0x374   :  { %v1046_v37 = vpop.f32.mrf.mxu1  ;;  %2231 = vmatprep.subr.mxu0 %v2270_v56  ;;  %2204 = vmatprep.subr.mxu1 %v2270_v56 }
 0x375   :  { %2191 = vmatprep.mubr.f32.mxu0 %v1046_v37  ;;  %2232 = vmatpush3.msra.mxu0 %v2570_v58  ;;  %v1154_v58 = vpop.f32.mrf.mxu0 }
 0x376   :  { %2192 = vmatmul.mubr.f32.gmra.mxu0 %v2079_v30  ;;  %2233 = vmatprep.subr.mxu0 %v2270_v56 }
 0x377   :  { %2234 = vmatpush3.msra.mxu0 %v2579_v59  ;;  %2205 = vmatpush3.msra.mxu1 %v2606_v62 }
 0x378   :  { %2235 = vmatprep.subr.mxu0 %v2270_v56  ;;  %2206 = vmatprep.subr.mxu1 %v2270_v56 }
 0x379   :  { %2236 = vmatpush3.msra.mxu0 %v2588_v60  ;;  %2207 = vmatpush3.msra.mxu1 %v2615_v63  ;;  %v2117_v60 = vpop.f32.mrf.mxu0 }
 0x37a   :  { %2237 = vmatprep.subr.mxu0 %v2270_v56  ;;  %2208 = vmatprep.subr.mxu1 %v2270_v56 }
 0x37b   :  { %2238 = vmatpush3.msra.mxu0 %v2597_v61  ;;  %2209 = vmatpush3.msra.mxu1 %v2624_v0 }
 0x37c   :  { %2239 = vmatprep.subr.mxu0 %v2270_v56  ;;  %2210 = vmatprep.subr.mxu1 %v2270_v56 }
 0x37d   :  { %2240 = vmatpush3.msra.mxu0 %v2606_v62  ;;  %2211 = vmatpush3.msra.mxu1 %v2633_v1  ;;  %v1164_v62 = vpop.f32.mrf.mxu0 }
 0x37e   :  { %2241 = vmatprep.subr.mxu0 %v2270_v56  ;;  %2212 = vmatprep.subr.mxu1 %v2270_v56 }
 0x37f   :  { %2242 = vmatpush3.msra.mxu0 %v2615_v63  ;;  %2213 = vmatpush3.msra.mxu1 %v2642_v2 }
 0x380   :  { %2243 = vmatprep.subr.mxu0 %v2270_v56  ;;  %2214 = vmatprep.subr.mxu1 %v2270_v56 }
 0x381   :  { %2244 = vmatpush3.msra.mxu0 %v2624_v0  ;;  %2215 = vmatpush3.msra.mxu1 %v2651_v3 }
 0x382   :  { %2245 = vmatprep.subr.mxu0 %v2270_v56  ;;  %2216 = vmatprep.subr.mxu1 %v2270_v56 }
 0x383   :  { %2246 = vmatpush3.msra.mxu0 %v2633_v1  ;;  %2217 = vmatpush3.msra.mxu1 %v2660_v4 }
 0x384   :  { %2247 = vmatprep.subr.mxu0 %v2270_v56  ;;  %2218 = vmatprep.subr.mxu1 %v2270_v56 }
 0x385   :  { %2248 = vmatpush3.msra.mxu0 %v2642_v2  ;;  %2219 = vmatpush3.msra.mxu1 %v2669_v5 }
 0x386   :  { %2249 = vmatprep.subr.mxu0 %v2270_v56  ;;  %2220 = vmatprep.subr.mxu1 %v2270_v56 }
 0x387   :  { %2250 = vmatpush3.msra.mxu0 %v2651_v3  ;;  %2221 = vmatpush3.msra.mxu1 %v2678_v6 }
 0x388   :  { %2251 = vmatprep.subr.mxu0 %v2270_v56  ;;  %2222 = vmatprep.subr.mxu1 %v2270_v56 }
 0x389   :  { %2252 = vmatpush3.msra.mxu0 %v2660_v4  ;;  %2223 = vmatpush3.msra.mxu1 %v2687_v7 }
 0x38a   :  { %2253 = vmatprep.subr.mxu0 %v2270_v56  ;;  %2224 = vmatprep.subr.mxu1 %v2270_v56 }
 0x38b   :  { %2254 = vmatpush3.msra.mxu0 %v2669_v5  ;;  %2225 = vmatpush3.msra.mxu1 %v2693_v8 }
 0x38c   :  { %2255 = vmatprep.subr.mxu0 %v2270_v56  ;;  %2261 = vmatprep.mubr.msk.f32.mxu0 %vm2271_vm2, %v2270_v56 }
 0x38d   :  { %2256 = vmatpush3.msra.mxu0 %v2678_v6 }
 0x38e   :  { %2257 = vmatprep.subr.mxu0 %v2270_v56 }
 0x38f   :  { %2258 = vmatpush3.msra.mxu0 %v2687_v7 }
 0x390   :  { %2259 = vmatprep.subr.mxu0 %v2270_v56 }
 0x391   :  { %2260 = vmatpush3.msra.mxu0 %v2693_v8 }
 0x42a   :  { %v2152_v59 = vpop.f32.mrf.mxu1 }
 0x42b   :  { %v1245_v1 = vadd.f32 %v2152_v59, %v2114_v57  ;;  %v1657_v57 = vld [vmem:[%s3005_s8] ss:$0 sm:$0xff] }
 0x42c   :  { %v1239_v61 = vpop.f32.mrf.mxu1 }
 0x42d   :  { %v1240_v2 = vadd.f32 %v1239_v61, %v1154_v58 }
 0x42e   :  { %v2155_v63 = vpop.f32.mrf.mxu1 }
 0x42f   :  { %v1255_v7 = vadd.f32 %v2155_v63, %v2117_v60  ;;  %v164_v63 = vadd.f32 %v1575_v34, %v2543_v45 }
 0x430   :  { %v1249_v3 = vpop.f32.mrf.mxu1 }
 0x431   :  { %v1250_v40 = vadd.f32 %v1249_v3, %v1164_v62  ;;  %v169_v62 = vadd.f32 %v2541_v44, %v1575_v34 }
 0x432   :  { %v2190_v0 = vpop.f32.mrf.mxu0 }
 0x433   :  { %v1361_v5 = vadd.f32 %v2190_v0, %v1245_v1  ;;  %v179_v0 = vadd.f32 %v2545_v46, %v1575_v34  ;;  %v174_v1 = vadd.f32 %v1575_v34, %v2547_v47 }
 0x434   :  { %v1341_v4 = vpop.f32.mrf.mxu0 }
 0x435   :  { %v1360_v6 = vadd.f32 %v1341_v4, %v1240_v2  ;;  %v1376_v8 = vmul.f32 %v1361_v5, %v1361_v5 }
 0x436   :  { %v2193_v29 = vpop.f32.mrf.mxu0 }
 0x437   :  { %v1375_v56 = vmul.f32 %v1360_v6, %v1360_v6  ;;  %v1366_v39 = vadd.f32 %v1361_v5, %v1360_v6  ;;  %v1363_v41 = vadd.f32 %v2193_v29, %v1255_v7 }
 0x438   :  { %v1351_v38 = vpop.f32.mrf.mxu0 }
 0x439   :  { %v1362_v42 = vadd.f32 %v1351_v38, %v1250_v40  ;;  %v1379_v20 = vadd.f32 %v1376_v8, %v1375_v56  ;;  %v1378_v23 = vmul.f32 %v1363_v41, %v1363_v41 }
 0x43b   :  { %v1367_v21 = vadd.f32 %v1366_v39, %v1362_v42  ;;  %v1377_v22 = vmul.f32 %v1362_v42, %v1362_v42 }
 0x43d   :  { %v1368_v43 = vadd.f32 %v1367_v21, %v1363_v41  ;;  %v1380_v24 = vadd.f32 %v1379_v20, %v1377_v22 }
 0x43f   :  { %v1369_v48 = vrot.slane %v1368_v43, 4  ;;  %v1381_v26 = vadd.f32 %v1380_v24, %v1378_v23 }
 0x441   :  { %v1370_v49 = vadd.f32 %v1369_v48, %v1368_v43  ;;  %v1382_v28 = vrot.slane %v1381_v26, 4 }
 0x443   :  { %v1371_v50 = vrot.slane %v1370_v49, 2  ;;  %v1383_v51 = vadd.f32 %v1382_v28, %v1381_v26 }
 0x445   :  { %v1372_v52 = vadd.f32 %v1371_v50, %v1370_v49  ;;  %v1384_v53 = vrot.slane %v1383_v51, 2 }
 0x447   :  { %v1373_v54 = vrot.slane %v1372_v52, 1  ;;  %v1385_v55 = vadd.f32 %v1384_v53, %v1383_v51 }
 0x449   :  { %v1374_v9 = vadd.f32 %v1373_v54, %v1372_v52  ;;  %v1386_v11 = vrot.slane %v1385_v55, 1 }
 0x44b   :  { %2227 = vmatmul.mubr.f32.vlgmr.msra.gmra.mxu1 %v1374_v9  ;;  %v1387_v12 = vadd.f32 %v1386_v11, %v1385_v55 }
 0x44d   :  { %2262 = vmatmul.mubr.f32.vlgmr.msra.gmra.mxu0 %v1387_v12 }
 0x50b   :  { %v1454_v13 = vpop.f32.mrf.mxu1 }
 0x50c   :  { %v1528_v14 = vmul.f32 %v1454_v13, %v1454_v13  ;;  %v1533_v25 = vrot.slane %v1454_v13, %v2778_v10 }
 0x50d   :  { %v2228_v15 = vpop.f32.mrf.mxu1  ;;  %v1524_v16 = vpop.f32.mrf.mxu0 }
 0x50e   :  { %v1529_v17 = vsub.f32 %v1524_v16, %v1528_v14  ;;  %v1534_v33 = vsub.f32 %v1360_v6, %v1533_v25  ;;  %v1535_v35 = vsub.f32 %v1361_v5, %v1533_v25  ;;  %v1536_v36 = vsub.f32 %v1362_v42, %v1533_v25 }
 0x50f   :  { %v2263_v19 = vpop.f32.mrf.mxu0  ;;  %v1537_v30 = vsub.f32 %v1363_v41, %v1533_v25 }
 0x510   :  { %v1538_v18 = vadd.f32 1e-05, %v1529_v17 }
 0x512   :  { %2268 = vrsqrt.f32 %v1538_v18 }
 0x51f   :  { %v2269_v31 = vpop.eup %2268 }
 0x520   :  { %v1540_v32 = vmul.f32 %v2269_v31, %v1364_v27 }
 0x522   :  { %v1544_v37 = vrot.slane %v1540_v32, %v2778_v10 }
 0x524   :  { %v1545_v58 = vmul.f32 %v1544_v37, %v1534_v33  ;;  %v1546_v59 = vmul.f32 %v1544_v37, %v1535_v35  ;;  %v1547_v60 = vmul.f32 %v1544_v37, %v1536_v36  ;;  %v1548_v61 = vmul.f32 %v1544_v37, %v1537_v30 }
 0x526   :  { %v1555_v2 = vadd.f32 %v1657_v57, %v1545_v58  ;;  %v1556_v3 = vadd.f32 %v1657_v57, %v1546_v59  ;;  %v1557_v4 = vadd.f32 %v1657_v57, %v1547_v60  ;;  %v1558_v10 = vadd.f32 %v1657_v57, %v1548_v61 }
 0x528   :  { %v1559_v5 = vadd.f32 %v1555_v2, %v164_v63  ;;  %v1560_v6 = vadd.f32 %v1556_v3, %v169_v62  ;;  %v1561_v29 = vadd.f32 %v1557_v4, %v174_v1  ;;  %v1562_v7 = vadd.f32 %v1558_v10, %v179_v0 }
 0x52a   :  { %v1563_v40 = vmax.f32 %v1559_v5, 0.0  ;;  %v1564_v56 = vmax.f32 %v1560_v6, 0.0  ;;  %v1565_v38 = vmax.f32 %v1561_v29, 0.0  ;;  %v1566_v8 = vmax.f32 %v1562_v7, 0.0 }
 0x52c   :  { %1567 = vst [vmem:[%s3006_s12] sm:$0xff] %v1563_v40  ;;  %1568 = vst [vmem:[%s3006_s12 + $0x8] sm:$0xff] %v1564_v56 }
 0x52d   :  { %1569 = vst [vmem:[%s3006_s12 + $0x10] sm:$0xff] %v1565_v38  ;;  %1570 = vst [vmem:[%s3006_s12 + $0x18] sm:$0xff] %v1566_v8 }

</bundles_post_ra>
